<compile_context>
chip_gen: v6e
topology: v6e:2x2x1
jax: 0.10.0
libtpu: 0.0.40
codegen_flags: <defaults>
</compile_context>

<pallas_src>
import functools

import jax
import jax.numpy as jnp
from jax.experimental import pallas as pl
from jax.experimental.pallas import tpu as pltpu

LANE = 128
SUBLANE = 8


def _round_up(x: int, m: int) -> int:
    return (x + m - 1) // m * m


def classifier_kernel(x_ref, w1_ref, b1_ref, w2_ref, b2_ref, o_ref):
    # x_ref : (TB, D)        flattened input tile
    # w1_ref: (D, H)         fc1 weight, (in, out) layout, VMEM-resident
    # b1_ref: (1, H)         fc1 bias
    # w2_ref: (H, C_pad)     fc2 weight, (in, out) layout, zero-padded to 128 lanes
    # b2_ref: (1, C_pad)     fc2 bias, zero-padded
    # o_ref : (TB, C_pad)    lane-dense logits tile
    x = x_ref[...]
    h = jnp.dot(x, w1_ref[...], preferred_element_type=jnp.float32) + b1_ref[...]
    h = jnp.maximum(h, 0.0)  # ReLU
    out = jnp.dot(h, w2_ref[...], preferred_element_type=jnp.float32) + b2_ref[...]
    o_ref[...] = out.astype(o_ref.dtype)


def prepare_classifier_params(w1, b1, w2, b2):
    """One-time parameter prep (hoisted out of the per-call path).

    w1: (H, D), b1: (H,), w2: (C, H), b2: (C,)  -- PyTorch layout.
    Returns (w1_t, b1_2d, w2_t_pad, b2_2d_pad, num_classes) with weights in
    (in, out) layout and the class dim zero-padded up to a lane-dense 128.
    """
    H, D = w1.shape
    C = w2.shape[0]
    C_pad = _round_up(C, LANE)

    w1_t = jnp.transpose(w1).astype(jnp.float32)                       # (D, H)
    b1_2d = b1.reshape(1, H).astype(jnp.float32)                       # (1, H)
    w2_t = jnp.zeros((H, C_pad), jnp.float32).at[:, :C].set(
        jnp.transpose(w2).astype(jnp.float32))                         # (H, C_pad)
    b2_2d = jnp.zeros((1, C_pad), jnp.float32).at[:, :C].set(
        b2.reshape(1, C).astype(jnp.float32))                          # (1, C_pad)
    return w1_t, b1_2d, w2_t, b2_2d, C


@functools.partial(jax.jit, static_argnames=("num_classes",))
def classifier_forward(x_nchw, w1_t, b1_2d, w2_t, b2_2d, *, num_classes):
    """x_nchw: (B, in_features, 2, 2) float32.  Returns (B, num_classes) logits."""
    B = x_nchw.shape[0]
    x_flat = x_nchw.reshape(B, -1)                  # matches torch .view(B, -1)
    D = x_flat.shape[1]
    H = w1_t.shape[1]                               # 128
    C_pad = w2_t.shape[1]                           # 128 (padded class dim)

    # Batch tiling: TB is a multiple of 8 sublanes, capped at 256; pad B up to
    # a multiple of TB so every grid step sees a full tile.
    B8 = _round_up(B, SUBLANE)
    TB = min(256, B8)
    B_pad = _round_up(B8, TB)
    if B_pad != B:
        x_flat = jnp.pad(x_flat, ((0, B_pad - B), (0, 0)))
    num_blocks = B_pad // TB

    out_padded = pl.pallas_call(
        classifier_kernel,
        out_shape=jax.ShapeDtypeStruct((B_pad, C_pad), jnp.float32),
        grid=(num_blocks,),
        in_specs=[
            pl.BlockSpec((TB, D), lambda i: (i, 0)),      # x tile, pipelined
            pl.BlockSpec((D, H), lambda i: (0, 0)),       # w1, resident
            pl.BlockSpec((1, H), lambda i: (0, 0)),       # b1, resident
            pl.BlockSpec((H, C_pad), lambda i: (0, 0)),   # w2 (padded), resident
            pl.BlockSpec((1, C_pad), lambda i: (0, 0)),   # b2 (padded), resident
        ],
        out_specs=pl.BlockSpec((TB, C_pad), lambda i: (i, 0)),
        compiler_params=pltpu.CompilerParams(
            dimension_semantics=("parallel",),            # shard batch across TCs (v7x)
        ),
    )(x_flat, w1_t, b1_2d, w2_t, b2_2d)

    # Slice away padded batch rows and padded class lanes.
    return out_padded[:B, :num_classes]


if __name__ == "__main__":
    # Small shapes consistent with the module: Encoder3 output is
    # (B, 16, 2, 2) -> flattened D = 64; num_classes = 10.
    num_classes = 10
    in_features = 16          # Encoder3.get_out_features()
    B = 8
    D = 2 * 2 * in_features   # 64
    H = 128

    key = jax.random.PRNGKey(0)
    k_x, k_w1, k_b1, k_w2, k_b2 = jax.random.split(key, 5)

    x = jax.random.normal(k_x, (B, in_features, 2, 2), dtype=jnp.float32)

    # Deterministic parameter init (PyTorch-style uniform bounds, shape only).
    bound1 = 1.0 / jnp.sqrt(D)
    w1 = jax.random.uniform(k_w1, (H, D), minval=-bound1, maxval=bound1, dtype=jnp.float32)
    b1 = jax.random.uniform(k_b1, (H,), minval=-bound1, maxval=bound1, dtype=jnp.float32)
    bound2 = 1.0 / jnp.sqrt(H)
    w2 = jax.random.uniform(k_w2, (num_classes, H), minval=-bound2, maxval=bound2, dtype=jnp.float32)
    b2 = jax.random.uniform(k_b2, (num_classes,), minval=-bound2, maxval=bound2, dtype=jnp.float32)

    # One-time param prep (transpose + lane padding) — NOT in the per-call path.
    w1_t, b1_2d, w2_t, b2_2d, C = prepare_classifier_params(w1, b1, w2, b2)

    out = classifier_forward(x, w1_t, b1_2d, w2_t, b2_2d, num_classes=C)
    out = jax.block_until_ready(out)

    # Reference in plain JAX to sanity-check semantics.
    x_flat = x.reshape(B, -1)
    ref = jnp.maximum(x_flat @ w1.T + b1, 0.0) @ w2.T + b2
    assert out.shape == (B, num_classes), out.shape
    assert jnp.allclose(out, ref, atol=1e-5, rtol=1e-5)

    print("KERNEL_OK")
</pallas_src>

<mosaic_0001>
module attributes {stable_mosaic.version = 11 : i64} {
  func.func @classifier_kernel(%arg0: i32, %arg1: memref<8x64xf32, #tpu.memory_space<vmem>>, %arg2: memref<64x128xf32, #tpu.memory_space<vmem>>, %arg3: memref<1x128xf32, #tpu.memory_space<vmem>>, %arg4: memref<128x128xf32, #tpu.memory_space<vmem>>, %arg5: memref<1x128xf32, #tpu.memory_space<vmem>>, %arg6: memref<8x128xf32, #tpu.memory_space<vmem>>) attributes {dimension_semantics = [#tpu.dimension_semantics<parallel>], iteration_bounds = array<i64: 1>, scalar_prefetch = 0 : i64, scratch_operands = 0 : i64, tpu.core_type = #tpu.core_type<tc>, window_params = [{transform_indices = @transform_0, window_bounds = array<i64: 8, 64>}, {pipeline_mode = #tpu.pipeline_mode<synchronous>, transform_indices = @transform_1, window_bounds = array<i64: 64, 128>}, {pipeline_mode = #tpu.pipeline_mode<synchronous>, transform_indices = @transform_2, window_bounds = array<i64: 1, 128>}, {pipeline_mode = #tpu.pipeline_mode<synchronous>, transform_indices = @transform_3, window_bounds = array<i64: 128, 128>}, {pipeline_mode = #tpu.pipeline_mode<synchronous>, transform_indices = @transform_4, window_bounds = array<i64: 1, 128>}, {transform_indices = @transform_5, window_bounds = array<i64: 8, 128>}]} {
    %c0 = arith.constant 0 : index
    %c0_0 = arith.constant 0 : index
    %0 = vector.load %arg1[%c0, %c0_0] : memref<8x64xf32, #tpu.memory_space<vmem>>, vector<8x64xf32>
    %c0_1 = arith.constant 0 : index
    %c0_2 = arith.constant 0 : index
    %1 = vector.load %arg2[%c0_1, %c0_2] : memref<64x128xf32, #tpu.memory_space<vmem>>, vector<64x128xf32>
    %cst = arith.constant dense<0.000000e+00> : vector<8x128xf32>
    %2 = tpu.matmul %0, %1, %cst {dimension_numbers = #tpu.dot_dimension_numbers<[1], [0], [0], [1], [0, 0, 1, 1], [], []>} : vector<8x64xf32>, vector<64x128xf32>, vector<8x128xf32> -> vector<8x128xf32>
    %c0_3 = arith.constant 0 : index
    %c0_4 = arith.constant 0 : index
    %3 = vector.load %arg3[%c0_3, %c0_4] : memref<1x128xf32, #tpu.memory_space<vmem>>, vector<1x128xf32>
    %4 = vector.broadcast %3 : vector<1x128xf32> to vector<8x128xf32>
    %5 = arith.addf %2, %4 : vector<8x128xf32>
    %cst_5 = arith.constant 0.000000e+00 : f32
    %6 = vector.broadcast %cst_5 : f32 to vector<8x128xf32>
    %7 = arith.maximumf %5, %6 : vector<8x128xf32>
    %c0_6 = arith.constant 0 : index
    %c0_7 = arith.constant 0 : index
    %8 = vector.load %arg4[%c0_6, %c0_7] : memref<128x128xf32, #tpu.memory_space<vmem>>, vector<128x128xf32>
    %cst_8 = arith.constant dense<0.000000e+00> : vector<8x128xf32>
    %9 = tpu.matmul %7, %8, %cst_8 {dimension_numbers = #tpu.dot_dimension_numbers<[1], [0], [0], [1], [0, 0, 1, 1], [], []>} : vector<8x128xf32>, vector<128x128xf32>, vector<8x128xf32> -> vector<8x128xf32>
    %c0_9 = arith.constant 0 : index
    %c0_10 = arith.constant 0 : index
    %10 = vector.load %arg5[%c0_9, %c0_10] : memref<1x128xf32, #tpu.memory_space<vmem>>, vector<1x128xf32>
    %11 = vector.broadcast %10 : vector<1x128xf32> to vector<8x128xf32>
    %12 = arith.addf %9, %11 : vector<8x128xf32>
    %c0_11 = arith.constant 0 : index
    %c0_12 = arith.constant 0 : index
    %13 = vector.load %arg6[%c0_11, %c0_12] : memref<8x128xf32, #tpu.memory_space<vmem>>, vector<8x128xf32>
    tpu.vector_store %arg6[%c0_11, %c0_12], %12 {strides = array<i32>} : memref<8x128xf32, #tpu.memory_space<vmem>>, vector<8x128xf32>,
    return
  }
  func.func @transform_0(%arg0: i32) -> (i32, i32) {
    %c0_i32 = arith.constant 0 : i32
    %c0_i32_0 = arith.constant 0 : i32
    return %arg0, %c0_i32 : i32, i32
  }
  func.func @transform_1(%arg0: i32) -> (i32, i32) {
    %c0_i32 = arith.constant 0 : i32
    %c0_i32_0 = arith.constant 0 : i32
    %c0_i32_1 = arith.constant 0 : i32
    return %c0_i32, %c0_i32_0 : i32, i32
  }
  func.func @transform_2(%arg0: i32) -> (i32, i32) {
    %c0_i32 = arith.constant 0 : i32
    %c0_i32_0 = arith.constant 0 : i32
    %c0_i32_1 = arith.constant 0 : i32
    return %c0_i32, %c0_i32_0 : i32, i32
  }
  func.func @transform_3(%arg0: i32) -> (i32, i32) {
    %c0_i32 = arith.constant 0 : i32
    %c0_i32_0 = arith.constant 0 : i32
    %c0_i32_1 = arith.constant 0 : i32
    return %c0_i32, %c0_i32_0 : i32, i32
  }
  func.func @transform_4(%arg0: i32) -> (i32, i32) {
    %c0_i32 = arith.constant 0 : i32
    %c0_i32_0 = arith.constant 0 : i32
    %c0_i32_1 = arith.constant 0 : i32
    return %c0_i32, %c0_i32_0 : i32, i32
  }
  func.func @transform_5(%arg0: i32) -> (i32, i32) {
    %c0_i32 = arith.constant 0 : i32
    %c0_i32_0 = arith.constant 0 : i32
    return %arg0, %c0_i32 : i32, i32
  }
}

</mosaic_0001>

<bundles_post_ra>
// kernel: classifier_forward.1
= control target key start
LH: loop header
LB: loop body
LE: loop exit
PB: predicated region body
PF: predicated region fallthrough
CT: control target
= control target key end

     0   :  { %10 = vsyncpa [#allocation3], 0  ;;  %s493_s0 = inlined_call_operand.vmem [shape: f32[8,64], index: 0, kind: input, shape index: {}]   ;;  %s494_s1 = inlined_call_operand.hbm [shape: f32[64,128], index: 1, kind: input, shape index: {}]   ;;  %s495_s2 = inlined_call_operand.vmem [shape: f32[1,128], index: 2, kind: input, shape index: {}]   ;;  %s496_s3 = inlined_call_operand.vmem [shape: f32[128,128], index: 3, kind: input, shape index: {}]   ;;  %s497_s4 = inlined_call_operand.vmem [shape: f32[1,128], index: 4, kind: input, shape index: {}]   ;;  %s498_s5 = inlined_call_operand.hbm [shape: f32[8,128], index: 5, kind: output, shape index: {}]  }
   0x1   :  { %11 = vsyncpa [#allocation4], 0  ;;  %s368_s18 = smov [#allocation2]  }
   0x2   :  { %s19_s19 = sshll.u32 %s368_s18, 4  ;;  %s20_s19 = int_to_ptr.vmem [resolvable:$true] %s19_s19 }
   0x3   :  { %s332_s20 = scalar_lea.vmem %s20_s19, 1024  ;;  %p337_p1 = scmp.lt.s32.totalorder %s20_s19, %s20_s19 }
   0x4   :  { %p333_p0 = scmp.ne.s32.totalorder %s20_s19, %s332_s20  ;;  %p338_p2 = scmp.lt.s32.totalorder %s332_s20, %s332_s20 }
   0x6   :  { %p339_p3 = por %p338_p2, %p337_p1 }
   0x8   :  { %p340_p4 = pnand %p339_p3, %p333_p0 }
   0xa   :  { %343 = shalt.err (!%p340_p4)
}
   0xb   :  { %s369_s21 = smov 128   ;;  %s370_s22 = smov 8  }
   0xc   :  { %25 = dma.hbm_to_vmem [thread:$0]  %s494_s1, 1024, %s20_s19, [#allocation3], %s369_s21, %s369_s21, %s370_s22  }
   0xd   :  { %364 = dma.done.wait [#allocation3], 1024  }
   0xe   :  { %365 = vsyncadd [#allocation3], 4294966272  ;;  %v371_v0 = vmov 0.0   ;;  %vm372_vm0 = vmmov 0   ;;  %v43_v1 = vld [vmem:[#allocation2 + $0x38] sm:$0xff]  ;;  %v42_v2 = vld [vmem:[#allocation2 + $0x30] sm:$0xff] }
   0xf   :  { %264 = vmatprep.subr.mxu0 %v371_v0  ;;  %280 = vmatprep.mubr.msk.f32.mxu0 %vm372_vm0, %v371_v0  ;;  %v41_v3 = vld [vmem:[#allocation2 + $0x28] sm:$0xff]  ;;  %v141_v4 = vld [vmem:[%s496_s3 + $0x78] sm:$0xff]  ;;  %v140_v5 = vld [vmem:[%s496_s3 + $0x70] sm:$0xff]  ;;  %vm51_vm1 = vcmask 523264   ;;  %s373_s10 = smov [#allocation5]  }
  0x10   :  { %283 = vmatprep.subr.mxu1 %v371_v0  ;;  %315 = vmatprep.mubr.msk.f32.mxu1 %vm372_vm0, %v371_v0  ;;  %v40_v6 = vld [vmem:[#allocation2 + $0x20] sm:$0xff]  ;;  %v139_v7 = vld [vmem:[%s496_s3 + $0x68] sm:$0xff]  ;;  %v39_v8 = vld [vmem:[#allocation2 + $0x18] sm:$0xff]  ;;  %s226_s11 = sshll.u32 %s373_s10, 4  ;;  %s227_s11 = int_to_ptr.vmem [resolvable:$true] %s226_s11 }
  0x11   :  { %265 = vmatpush3.msra.mxu0 %v43_v1  ;;  %284 = vmatpush3.msra.mxu1 %v141_v4  ;;  %v138_v9 = vld [vmem:[%s496_s3 + $0x60] sm:$0xff]  ;;  %v38_v10 = vld [vmem:[#allocation2 + $0x10] sm:$0xff]  ;;  %v137_v11 = vld [vmem:[%s496_s3 + $0x58] sm:$0xff]  ;;  %p349_p6 = scmp.lt.s32.totalorder %s227_s11, %s227_s11 }
  0x12   :  { %266 = vmatprep.subr.mxu0 %v371_v0  ;;  %285 = vmatprep.subr.mxu1 %v371_v0  ;;  %v37_v12 = vld [vmem:[#allocation2 + $0x8] sm:$0xff]  ;;  %v136_v13 = vld [vmem:[%s496_s3 + $0x50] sm:$0xff]  ;;  %v36_v14 = vld [vmem:[#allocation2] sm:$0xff] }
  0x13   :  { %267 = vmatpush3.msra.mxu0 %v42_v2  ;;  %286 = vmatpush3.msra.mxu1 %v140_v5  ;;  %v35_v15 = vld [vmem:[%s493_s0] sm:$0xff]  ;;  %v135_v16 = vld [vmem:[%s496_s3 + $0x48] sm:$0xff]  ;;  %v133_v18 = vld [vmem:[%s496_s3 + $0x38] sm:$0xff] }
  0x14   :  { %268 = vmatprep.subr.mxu0 %v371_v0  ;;  %287 = vmatprep.subr.mxu1 %v371_v0  ;;  %v134_v17 = vld [vmem:[%s496_s3 + $0x40] sm:$0xff]  ;;  %v132_v19 = vld [vmem:[%s496_s3 + $0x30] sm:$0xff]  ;;  %v131_v20 = vld [vmem:[%s496_s3 + $0x28] sm:$0xff] }
  0x15   :  { %269 = vmatpush3.msra.mxu0 %v41_v3  ;;  %288 = vmatpush3.msra.mxu1 %v139_v7  ;;  %v130_v21 = vld [vmem:[%s496_s3 + $0x20] sm:$0xff]  ;;  %v129_v22 = vld [vmem:[%s496_s3 + $0x18] sm:$0xff]  ;;  %v128_v23 = vld [vmem:[%s496_s3 + $0x10] sm:$0xff] }
  0x16   :  { %270 = vmatprep.subr.mxu0 %v371_v0  ;;  %289 = vmatprep.subr.mxu1 %v371_v0  ;;  %v127_v24 = vld [vmem:[%s496_s3 + $0x8] sm:$0xff]  ;;  %v126_v25 = vld [vmem:[%s496_s3] sm:$0xff]  ;;  %s344_s3 = scalar_lea.vmem %s227_s11, 128 }
  0x17   :  { %271 = vmatpush3.msra.mxu0 %v40_v6  ;;  %290 = vmatpush3.msra.mxu1 %v138_v9  ;;  %v235_v26 = vld [vmem:[%s495_s2] ss:$0 sm:$0xff]  ;;  %p345_p5 = scmp.ne.s32.totalorder %s227_s11, %s344_s3  ;;  %p350_p7 = scmp.lt.s32.totalorder %s344_s3, %s344_s3 }
  0x18   :  { %272 = vmatprep.subr.mxu0 %v371_v0  ;;  %291 = vmatprep.subr.mxu1 %v371_v0  ;;  %v237_v31 = vld [vmem:[%s497_s4] ss:$0 sm:$0xff] }
  0x19   :  { %273 = vmatpush3.msra.mxu0 %v39_v8  ;;  %292 = vmatpush3.msra.mxu1 %v137_v11  ;;  %p351_p8 = por %p350_p7, %p349_p6 }
  0x1a   :  { %274 = vmatprep.subr.mxu0 %v371_v0  ;;  %293 = vmatprep.subr.mxu1 %v371_v0 }
  0x1b   :  { %275 = vmatpush3.msra.mxu0 %v38_v10  ;;  %294 = vmatpush3.msra.mxu1 %v136_v13  ;;  %p352_p9 = pnand %p351_p8, %p345_p5 }
  0x1c   :  { %276 = vmatprep.subr.mxu0 %v371_v0  ;;  %295 = vmatprep.subr.mxu1 %v371_v0 }
  0x1d   :  { %277 = vmatpush3.msra.mxu0 %v37_v12  ;;  %296 = vmatpush3.msra.mxu1 %v135_v16 }
  0x1e   :  { %278 = vmatprep.subr.mxu0 %v371_v0  ;;  %297 = vmatprep.subr.mxu1 %v371_v0 }
  0x1f   :  { %279 = vmatpush3.msra.mxu0 %v36_v14  ;;  %298 = vmatpush3.msra.mxu1 %v134_v17 }
  0x20   :  { %281 = vmatmul.mubr.msk.f32.vlgmr.msra.gmra.mxu0 %vm51_vm1, %v35_v15  ;;  %299 = vmatprep.subr.mxu1 %v371_v0 }
  0x21   :  { %300 = vmatpush3.msra.mxu1 %v133_v18 }
  0x22   :  { %301 = vmatprep.subr.mxu1 %v371_v0 }
  0x23   :  { %302 = vmatpush3.msra.mxu1 %v132_v19 }
  0x24   :  { %303 = vmatprep.subr.mxu1 %v371_v0 }
  0x25   :  { %304 = vmatpush3.msra.mxu1 %v131_v20 }
  0x26   :  { %305 = vmatprep.subr.mxu1 %v371_v0 }
  0x27   :  { %306 = vmatpush3.msra.mxu1 %v130_v21 }
  0x28   :  { %307 = vmatprep.subr.mxu1 %v371_v0 }
  0x29   :  { %308 = vmatpush3.msra.mxu1 %v129_v22 }
  0x2a   :  { %309 = vmatprep.subr.mxu1 %v371_v0 }
  0x2b   :  { %310 = vmatpush3.msra.mxu1 %v128_v23 }
  0x2c   :  { %311 = vmatprep.subr.mxu1 %v371_v0 }
  0x2d   :  { %312 = vmatpush3.msra.mxu1 %v127_v24 }
  0x2e   :  { %313 = vmatprep.subr.mxu1 %v371_v0 }
  0x2f   :  { %314 = vmatpush3.msra.mxu1 %v126_v25 }
  0xe0   :  { %v121_v27 = vpop.f32.mrf.mxu0 }
  0xe1   :  { %v122_v28 = vadd.f32 %v235_v26, %v121_v27 }
  0xe2   :  { %v282_v29 = vpop.f32.mrf.mxu0 }
  0xe3   :  { %v125_v30 = vmax.f32 %v122_v28, 0.0 }
  0xe5   :  { %316 = vmatmul.mubr.f32.vlgmr.msra.gmra.mxu1 %v125_v30 }
 0x1a5   :  { %v215_v32 = vpop.f32.mrf.mxu1 }
 0x1a6   :  { %v216_v33 = vadd.f32 %v237_v31, %v215_v32 }
 0x1a7   :  { %v317_v34 = vpop.f32.mrf.mxu1 }
 0x1a8   :  { %219 = vst [vmem:[#allocation5] sm:$0xff] %v216_v33 }
 0x1a9   :  { %355 = shalt.err (!%p352_p9)
}
 0x1aa   :  { %229 = dma.vmem_to_hbm [thread:$0]  %s227_s11, 128, %s498_s5, [#allocation4]  }
 0x1ab   :  { %366 = dma.done.wait [#allocation4], 128  }
 0x1ac   :  { %367 = vsyncadd [#allocation4], 4294967168 }
 0x1ad   :  { %233 = vsyncpa [#allocation3], 1 }
 0x1ae   :  { %234 = vsyncpa [#allocation4], 1 }

</bundles_post_ra>
